<compile_context>
chip_gen: v7x
topology: tpu7x:2x2x1
jax: 0.10.0
libtpu: 0.0.40
codegen_flags: <defaults>
</compile_context>

<pallas_src>
import functools

import jax
import jax.numpy as jnp
from jax.experimental import pallas as pl
from jax.experimental.pallas import tpu as pltpu


def _embed_kernel(p_ref, w_ref, b_ref, o_ref, *, bblk, hw):
    # p_ref: (bblk*hw, KPAD)  im2col patches (zero-padded along K, lane-dense)
    # w_ref: (KPAD, CPAD)     flattened conv weights (zero-padded)
    # b_ref: (1, CPAD)        conv bias (zero-padded)
    # o_ref: (bblk, CPAD)     per-image embeddings (padded channel lanes = 0)
    acc = jnp.dot(p_ref[...], w_ref[...], preferred_element_type=jnp.float32)
    acc = jnp.maximum(acc + b_ref[...], 0.0)            # bias + ReLU
    # AdaptiveAvgPool2d(1) + flatten(x, 1) == mean over the hw rows per image.
    acc = acc.reshape(bblk, hw, acc.shape[-1])
    o_ref[...] = jnp.mean(acc, axis=1)


def embedding_forward(x_nchw, weight_hwio, bias):
    """x_nchw: (B, Cin, H, W) float32 -> embeddings (B, Cout) float32."""
    B, CIN, H, W = x_nchw.shape
    KH, KW, _, COUT = weight_hwio.shape
    ph, pw = KH // 2, KW // 2
    HW = H * W
    K = KH * KW * CIN

    LANE = 128
    KPAD = ((K + LANE - 1) // LANE) * LANE
    CPAD = ((COUT + LANE - 1) // LANE) * LANE

    # ---- glue: NCHW -> NHWC, 'same' pad, im2col, lane padding --------------
    x_nhwc = jnp.transpose(x_nchw, (0, 2, 3, 1))
    x_pad = jnp.pad(x_nhwc, ((0, 0), (ph, ph), (pw, pw), (0, 0)))
    # Feature order (kh, kw, cin) matches weight_hwio.reshape(K, COUT).
    patches = jnp.concatenate(
        [x_pad[:, kh:kh + H, kw:kw + W, :]
         for kh in range(KH) for kw in range(KW)],
        axis=-1)                                        # (B, H, W, K)
    patches = patches.reshape(B * HW, K)
    patches = jnp.pad(patches, ((0, 0), (0, KPAD - K)))

    w_flat = jnp.pad(weight_hwio.reshape(K, COUT),
                     ((0, KPAD - K), (0, CPAD - COUT)))
    b_pad = jnp.pad(bias.reshape(1, COUT), ((0, 0), (0, CPAD - COUT)))

    # Whole (tiny) batch per grid step; axis kept "parallel" so larger batches
    # (BBLK < B) would still split across v7x's two TensorCores.
    BBLK = B
    kernel = functools.partial(_embed_kernel, bblk=BBLK, hw=HW)

    out = pl.pallas_call(
        kernel,
        out_shape=jax.ShapeDtypeStruct((B, CPAD), jnp.float32),
        grid_spec=pltpu.PrefetchScalarGridSpec(
            num_scalar_prefetch=0,
            grid=(B // BBLK,),
            in_specs=[
                pl.BlockSpec((BBLK * HW, KPAD), lambda i: (i, 0)),
                pl.BlockSpec((KPAD, CPAD), lambda i: (0, 0)),
                pl.BlockSpec((1, CPAD), lambda i: (0, 0)),
            ],
            out_specs=pl.BlockSpec((BBLK, CPAD), lambda i: (i, 0)),
        ),
        compiler_params=pltpu.CompilerParams(
            dimension_semantics=("parallel",),
            allow_input_fusion=[True, True, True],
        ),
    )(patches, w_flat, b_pad)

    # flatten(x, 1): slice away the zero-padded channel lanes -> (B, Cout).
    return out[:, :COUT]


def _reference_forward(x_nchw, weight_hwio, bias):
    # Pure-JAX reference: conv -> relu -> global average pool -> flatten.
    y = jax.lax.conv_general_dilated(
        x_nchw, weight_hwio,
        window_strides=(1, 1), padding="SAME",
        dimension_numbers=("NCHW", "HWIO", "NCHW"))
    y = y + bias.reshape(1, -1, 1, 1)
    y = jnp.maximum(y, 0.0)
    return jnp.mean(y, axis=(2, 3))


if __name__ == "__main__":
    B, CIN, H, W = 2, 4, 16, 16
    COUT, KH, KW = 32, 3, 3

    key = jax.random.PRNGKey(0)
    kx, kw, kb = jax.random.split(key, 3)
    x = jax.random.normal(kx, (B, CIN, H, W), dtype=jnp.float32)
    weight = jax.random.normal(kw, (KH, KW, CIN, COUT), dtype=jnp.float32) * 0.1
    bias = jax.random.normal(kb, (COUT,), dtype=jnp.float32) * 0.01

    emb = jax.jit(embedding_forward)(x, weight, bias)
    emb = jax.block_until_ready(emb)

    ref = _reference_forward(x, weight, bias)
    assert emb.shape == (B, COUT)
    assert jnp.allclose(emb, ref, rtol=1e-4, atol=1e-5)

    print("KERNEL_OK")
</pallas_src>

<mosaic_0001>
module attributes {stable_mosaic.version = 11 : i64} {
  func.func @_embed_kernel(%arg0: i32, %arg1: memref<512x128xf32, #tpu.memory_space<vmem>>, %arg2: memref<128x128xf32, #tpu.memory_space<vmem>>, %arg3: memref<1x128xf32, #tpu.memory_space<vmem>>, %arg4: memref<2x128xf32, #tpu.memory_space<vmem>>) attributes {dimension_semantics = [#tpu.dimension_semantics<parallel>], iteration_bounds = array<i64: 1>, scalar_prefetch = 0 : i64, scratch_operands = 0 : i64, tpu.core_type = #tpu.core_type<tc>, window_params = [{transform_indices = @transform_0, window_bounds = array<i64: 512, 128>}, {pipeline_mode = #tpu.pipeline_mode<synchronous>, transform_indices = @transform_1, window_bounds = array<i64: 128, 128>}, {pipeline_mode = #tpu.pipeline_mode<synchronous>, transform_indices = @transform_2, window_bounds = array<i64: 1, 128>}, {transform_indices = @transform_3, window_bounds = array<i64: 2, 128>}]} {
    %c0 = arith.constant 0 : index
    %c0_0 = arith.constant 0 : index
    %0 = vector.load %arg1[%c0, %c0_0] : memref<512x128xf32, #tpu.memory_space<vmem>>, vector<512x128xf32>
    %c0_1 = arith.constant 0 : index
    %c0_2 = arith.constant 0 : index
    %1 = vector.load %arg2[%c0_1, %c0_2] : memref<128x128xf32, #tpu.memory_space<vmem>>, vector<128x128xf32>
    %cst = arith.constant dense<0.000000e+00> : vector<512x128xf32>
    %2 = tpu.matmul %0, %1, %cst {dimension_numbers = #tpu.dot_dimension_numbers<[1], [0], [0], [1], [0, 0, 1, 1], [], []>} : vector<512x128xf32>, vector<128x128xf32>, vector<512x128xf32> -> vector<512x128xf32>
    %c0_3 = arith.constant 0 : index
    %c0_4 = arith.constant 0 : index
    %3 = vector.load %arg3[%c0_3, %c0_4] : memref<1x128xf32, #tpu.memory_space<vmem>>, vector<1x128xf32>
    %4 = vector.broadcast %3 : vector<1x128xf32> to vector<512x128xf32>
    %5 = arith.addf %2, %4 : vector<512x128xf32>
    %cst_5 = arith.constant 0.000000e+00 : f32
    %6 = vector.broadcast %cst_5 : f32 to vector<512x128xf32>
    %7 = arith.maximumf %5, %6 : vector<512x128xf32>
    %8 = vector.shape_cast %7 : vector<512x128xf32> to vector<2x256x128xf32>
    %cst_6 = arith.constant dense<0.000000e+00> : vector<2x128xf32>
    %9 = vector.multi_reduction <add>, %8, %cst_6 [1] : vector<2x256x128xf32> to vector<2x128xf32>
    %cst_7 = arith.constant 2.560000e+02 : f32
    %10 = vector.broadcast %cst_7 : f32 to vector<2x128xf32>
    %11 = arith.divf %9, %10 : vector<2x128xf32>
    %c0_8 = arith.constant 0 : index
    %c0_9 = arith.constant 0 : index
    %12 = vector.load %arg4[%c0_8, %c0_9] : memref<2x128xf32, #tpu.memory_space<vmem>>, vector<2x128xf32>
    tpu.vector_store %arg4[%c0_8, %c0_9], %11 {strides = array<i32>} : memref<2x128xf32, #tpu.memory_space<vmem>>, vector<2x128xf32>,
    return
  }
  func.func @transform_0(%arg0: i32) -> (i32, i32) {
    %c0_i32 = arith.constant 0 : i32
    %c0_i32_0 = arith.constant 0 : i32
    return %arg0, %c0_i32 : i32, i32
  }
  func.func @transform_1(%arg0: i32) -> (i32, i32) {
    %c0_i32 = arith.constant 0 : i32
    %c0_i32_0 = arith.constant 0 : i32
    %c0_i32_1 = arith.constant 0 : i32
    return %c0_i32, %c0_i32_0 : i32, i32
  }
  func.func @transform_2(%arg0: i32) -> (i32, i32) {
    %c0_i32 = arith.constant 0 : i32
    %c0_i32_0 = arith.constant 0 : i32
    %c0_i32_1 = arith.constant 0 : i32
    return %c0_i32, %c0_i32_0 : i32, i32
  }
  func.func @transform_3(%arg0: i32) -> (i32, i32) {
    %c0_i32 = arith.constant 0 : i32
    %c0_i32_0 = arith.constant 0 : i32
    return %arg0, %c0_i32 : i32, i32
  }
}

</mosaic_0001>

<bundles_post_ra>
// kernel: embedding_forward.2
= control target key start
LH: loop header
LB: loop body
LE: loop exit
PB: predicated region body
PF: predicated region fallthrough
CT: control target
= control target key end

     0   :  { %s2296_s0 = inlined_call_operand.vmem [shape: f32[512,36], index: 0, kind: input, shape index: {}]   ;;  %s2297_s1 = inlined_call_operand.<no memory space> [shape: f32[], index: 1, kind: input, shape index: {}]   ;;  %s2298_s2 = inlined_call_operand.vmem [shape: f32[36,32], index: 2, kind: input, shape index: {}]   ;;  %s2299_s3 = inlined_call_operand.vmem [shape: f32[1,32], index: 3, kind: input, shape index: {}]   ;;  %s2300_s4 = inlined_call_operand.hbm [shape: f32[2,128], index: 4, kind: output, shape index: {}]  }
   0x1   :  { %v1787_v0 = vstv %s2297_s1 }
   0x2   :  { %v20_v1 = vlaneseq  ;;  %v657_v2 = vld [vmem:[%s2298_s2] sm:$0xff]  ;;  %v1472_v4 = vld [vmem:[%s2298_s2 + $0x8] sm:$0xff]  ;;  %v1473_v5 = vld [vmem:[%s2298_s2 + $0x10] sm:$0xff]  ;;  %v1697_v26 = vpack.c.bf16 %v1787_v0, %v1787_v0 }
   0x3   :  { %v1474_v6 = vld [vmem:[%s2298_s2 + $0x18] sm:$0xff]  ;;  %v763_v8 = vld [vmem:[%s2299_s3] sm:$0x1] }
   0x4   :  { %v1792_v3 = vand.u32 127, %v20_v1  ;;  %v718_v7 = vshrl.u32 %v20_v1, 7  ;;  %v1475_v9 = vld [vmem:[%s2298_s2 + $0x20] sm:$0xff] }
   0x5   :  { %v19_v15 = vld [vmem:[%s2296_s0] sm:$0xff] }
   0x6   :  { %vm23_vm0 = vcmp.lt.s32.totalorder %v1792_v3, 36  ;;  %vm666_vm1 = vcmp.lt.s32.totalorder %v1792_v3, 32  ;;  %v719_v10 = vadd.s32 32, %v718_v7  ;;  %vm767_vm2 = vcmp.lt.s32.totalorder %v718_v7, 1  ;;  %v1440_v16 = vld [vmem:[%s2296_s0 + $0x100] sm:$0xff] }
   0x7   :  { %v667_v11 = vsel %vm666_vm1, %v657_v2, %v1787_v0  ;;  %v681_v12 = vsel %vm666_vm1, %v1472_v4, %v1787_v0  ;;  %v696_v13 = vsel %vm666_vm1, %v1473_v5, %v1787_v0  ;;  %v711_v14 = vsel %vm666_vm1, %v1474_v6, %v1787_v0 }
   0x8   :  { %v1685_v17 = vpack.c.bf16 %v681_v12, %v667_v11  ;;  %v1689_v18 = vpack.c.bf16 %v711_v14, %v696_v13  ;;  %vm720_vm3 = vcmp.lt.s32.totalorder %v719_v10, 36  ;;  %v768_v19 = vsel %vm767_vm2, %v763_v8, %v1787_v0 }
   0x9   :  { %v721_v20 = vsel %vm720_vm3, %v1475_v9, %v1787_v0  ;;  %v773_v21 = vsel %vm666_vm1, %v768_v19, %v1787_v0  ;;  %v24_v23 = vsel %vm23_vm0, %v19_v15, %v1787_v0  ;;  %v343_v24 = vsel %vm23_vm0, %v1440_v16, %v1787_v0 }
   0xa   :  { %1686 = vmatprep.subr.bf16.mxu0 %v1685_v17  ;;  %1717 = vmatprep.subr.bf16.mxu1 %v1685_v17  ;;  %v726_v22 = vsel %vm666_vm1, %v721_v20, %v1787_v0  ;;  %775 = vst [vmem:[#allocation21] sm:$0x1] %v773_v21 }
   0xb   :  { %1688 = vmatpush3.bf16.msra.mxu0 %v1685_v17  ;;  %1725 = vmatpush3.bf16.msra.mxu1 %v1685_v17  ;;  %v1693_v25 = vpack.c.bf16 %v1787_v0, %v726_v22 }
   0xc   :  { %1690 = vmatprep.subr.bf16.mxu0 %v1689_v18  ;;  %1718 = vmatprep.subr.bf16.mxu1 %v1689_v18 }
   0xd   :  { %1589 = vmatprep.mubr.f32.mxu0 %v24_v23  ;;  %1637 = vmatprep.mubr.f32.mxu1 %v343_v24 }
   0xf   :  { %1692 = vmatpush3.bf16.msra.mxu0 %v1689_v18  ;;  %1726 = vmatpush3.bf16.msra.mxu1 %v1689_v18 }
  0x10   :  { %1694 = vmatprep.subr.bf16.mxu0 %v1693_v25  ;;  %1719 = vmatprep.subr.bf16.mxu1 %v1693_v25 }
  0x13   :  { %1696 = vmatpush3.bf16.msra.mxu0 %v1693_v25  ;;  %1727 = vmatpush3.bf16.msra.mxu1 %v1693_v25 }
  0x14   :  { %1698 = vmatprep.subr.bf16.mxu0 %v1697_v26  ;;  %1720 = vmatprep.subr.bf16.mxu1 %v1697_v26 }
  0x17   :  { %1700 = vmatpush3.bf16.msra.mxu0 %v1697_v26  ;;  %1728 = vmatpush3.bf16.msra.mxu1 %v1697_v26 }
  0x18   :  { %1702 = vmatprep.subr.bf16.mxu0 %v1697_v26  ;;  %1721 = vmatprep.subr.bf16.mxu1 %v1697_v26 }
  0x19   :  { %12 = vsyncpa [#allocation18], 0  ;;  %v1409_v27 = vld [vmem:[%s2296_s0 + $0x8] sm:$0xff]  ;;  %v1410_v29 = vld [vmem:[%s2296_s0 + $0x10] sm:$0xff]  ;;  %vm1391_vm4 = vcmask 1041409  }
  0x1a   :  { %v1441_v28 = vld [vmem:[%s2296_s0 + $0x108] sm:$0xff]  ;;  %v1442_v30 = vld [vmem:[%s2296_s0 + $0x110] sm:$0xff]  ;;  %v33_v31 = vsel %vm23_vm0, %v1409_v27, %v1787_v0  ;;  %v43_v33 = vsel %vm23_vm0, %v1410_v29, %v1787_v0  ;;  %v1411_v35 = vld [vmem:[%s2296_s0 + $0x18] sm:$0xff] }
  0x1b   :  { %1704 = vmatpush3.bf16.msra.mxu0 %v1697_v26  ;;  %1729 = vmatpush3.bf16.msra.mxu1 %v1697_v26  ;;  %v353_v32 = vsel %vm23_vm0, %v1441_v28, %v1787_v0  ;;  %v363_v34 = vsel %vm23_vm0, %v1442_v30, %v1787_v0  ;;  %v1443_v36 = vld [vmem:[%s2296_s0 + $0x118] sm:$0xff]  ;;  %v1412_v37 = vld [vmem:[%s2296_s0 + $0x20] sm:$0xff]  ;;  %v53_v39 = vsel %vm23_vm0, %v1411_v35, %v1787_v0  ;;  %v1413_v43 = vld [vmem:[%s2296_s0 + $0x28] sm:$0xff] }
  0x1c   :  { %1706 = vmatprep.subr.bf16.mxu0 %v1697_v26  ;;  %1722 = vmatprep.subr.bf16.mxu1 %v1697_v26  ;;  %v1444_v38 = vld [vmem:[%s2296_s0 + $0x120] sm:$0xff]  ;;  %v373_v40 = vsel %vm23_vm0, %v1443_v36, %v1787_v0  ;;  %v63_v41 = vsel %vm23_vm0, %v1412_v37, %v1787_v0  ;;  %v1445_v44 = vld [vmem:[%s2296_s0 + $0x128] sm:$0xff]  ;;  %v1414_v45 = vld [vmem:[%s2296_s0 + $0x30] sm:$0xff]  ;;  %v73_v47 = vsel %vm23_vm0, %v1413_v43, %v1787_v0 }
  0x1d   :  { %v383_v42 = vsel %vm23_vm0, %v1444_v38, %v1787_v0  ;;  %v1446_v46 = vld [vmem:[%s2296_s0 + $0x130] sm:$0xff]  ;;  %v393_v48 = vsel %vm23_vm0, %v1445_v44, %v1787_v0  ;;  %v83_v49 = vsel %vm23_vm0, %v1414_v45, %v1787_v0  ;;  %v1415_v51 = vld [vmem:[%s2296_s0 + $0x38] sm:$0xff]  ;;  %v1416_v53 = vld [vmem:[%s2296_s0 + $0x40] sm:$0xff] }
  0x1e   :  { %v403_v50 = vsel %vm23_vm0, %v1446_v46, %v1787_v0  ;;  %v1447_v52 = vld [vmem:[%s2296_s0 + $0x138] sm:$0xff]  ;;  %v1448_v54 = vld [vmem:[%s2296_s0 + $0x140] sm:$0xff]  ;;  %v93_v55 = vsel %vm23_vm0, %v1415_v51, %v1787_v0  ;;  %v103_v57 = vsel %vm23_vm0, %v1416_v53, %v1787_v0  ;;  %v1417_v59 = vld [vmem:[%s2296_s0 + $0x48] sm:$0xff] }
  0x1f   :  { %1708 = vmatpush3.bf16.msra.mxu0 %v1697_v26  ;;  %1730 = vmatpush3.bf16.msra.mxu1 %v1697_v26  ;;  %v413_v56 = vsel %vm23_vm0, %v1447_v52, %v1787_v0  ;;  %v423_v58 = vsel %vm23_vm0, %v1448_v54, %v1787_v0  ;;  %v1449_v60 = vld [vmem:[%s2296_s0 + $0x148] sm:$0xff]  ;;  %v1418_v61 = vld [vmem:[%s2296_s0 + $0x50] sm:$0xff]  ;;  %v113_v63 = vsel %vm23_vm0, %v1417_v59, %v1787_v0  ;;  %v1419_v5 = vld [vmem:[%s2296_s0 + $0x58] sm:$0xff] }
  0x20   :  { %1710 = vmatprep.subr.bf16.mxu0 %v1697_v26  ;;  %1723 = vmatprep.subr.bf16.mxu1 %v1697_v26  ;;  %v1450_v62 = vld [vmem:[%s2296_s0 + $0x150] sm:$0xff]  ;;  %v433_v1 = vsel %vm23_vm0, %v1449_v60, %v1787_v0  ;;  %v123_v2 = vsel %vm23_vm0, %v1418_v61, %v1787_v0  ;;  %v1451_v6 = vld [vmem:[%s2296_s0 + $0x158] sm:$0xff]  ;;  %v1420_v7 = vld [vmem:[%s2296_s0 + $0x60] sm:$0xff]  ;;  %v133_v9 = vsel %vm23_vm0, %v1419_v5, %v1787_v0 }
  0x21   :  { %v443_v4 = vsel %vm23_vm0, %v1450_v62, %v1787_v0  ;;  %v1452_v8 = vld [vmem:[%s2296_s0 + $0x160] sm:$0xff]  ;;  %v453_v10 = vsel %vm23_vm0, %v1451_v6, %v1787_v0  ;;  %v143_v11 = vsel %vm23_vm0, %v1420_v7, %v1787_v0  ;;  %v1421_v13 = vld [vmem:[%s2296_s0 + $0x68] sm:$0xff]  ;;  %v1422_v15 = vld [vmem:[%s2296_s0 + $0x70] sm:$0xff] }
  0x22   :  { %v463_v12 = vsel %vm23_vm0, %v1452_v8, %v1787_v0  ;;  %v1453_v14 = vld [vmem:[%s2296_s0 + $0x168] sm:$0xff]  ;;  %v1454_v16 = vld [vmem:[%s2296_s0 + $0x170] sm:$0xff]  ;;  %v153_v17 = vsel %vm23_vm0, %v1421_v13, %v1787_v0  ;;  %v163_v19 = vsel %vm23_vm0, %v1422_v15, %v1787_v0  ;;  %v1423_v21 = vld [vmem:[%s2296_s0 + $0x78] sm:$0xff] }
  0x23   :  { %1712 = vmatpush3.bf16.msra.mxu0 %v1697_v26  ;;  %1731 = vmatpush3.bf16.msra.mxu1 %v1697_v26  ;;  %v473_v18 = vsel %vm23_vm0, %v1453_v14, %v1787_v0  ;;  %v483_v20 = vsel %vm23_vm0, %v1454_v16, %v1787_v0  ;;  %v1455_v22 = vld [vmem:[%s2296_s0 + $0x178] sm:$0xff]  ;;  %v1424_v23 = vld [vmem:[%s2296_s0 + $0x80] sm:$0xff]  ;;  %v173_v25 = vsel %vm23_vm0, %v1423_v21, %v1787_v0  ;;  %v1425_v29 = vld [vmem:[%s2296_s0 + $0x88] sm:$0xff] }
  0x24   :  { %1714 = vmatprep.subr.bf16.mxu0 %v1697_v26  ;;  %1724 = vmatprep.subr.bf16.mxu1 %v1697_v26  ;;  %v1456_v24 = vld [vmem:[%s2296_s0 + $0x180] sm:$0xff]  ;;  %v183_v27 = vsel %vm23_vm0, %v1424_v23, %v1787_v0  ;;  %v1457_v30 = vld [vmem:[%s2296_s0 + $0x188] sm:$0xff]  ;;  %v1427_v37 = vld [vmem:[%s2296_s0 + $0x98] sm:$0xff] }
  0x25   :  { %v503_v28 = vsel %vm23_vm0, %v1456_v24, %v1787_v0  ;;  %v1459_v38 = vld [vmem:[%s2296_s0 + $0x198] sm:$0xff]  ;;  %v1429_v45 = vld [vmem:[%s2296_s0 + $0xa8] sm:$0xff] }
  0x26   :  { %v1461_v46 = vld [vmem:[%s2296_s0 + $0x1a8] sm:$0xff]  ;;  %v1431_v53 = vld [vmem:[%s2296_s0 + $0xb8] sm:$0xff] }
  0x27   :  { %1716 = vmatpush3.bf16.msra.mxu0 %v1697_v26  ;;  %1732 = vmatpush3.bf16.msra.mxu1 %v1697_v26  ;;  %v493_v26 = vsel %vm23_vm0, %v1455_v22, %v1787_v0  ;;  %v1463_v54 = vld [vmem:[%s2296_s0 + $0x1b8] sm:$0xff]  ;;  %v1433_v61 = vld [vmem:[%s2296_s0 + $0xc8] sm:$0xff] }
  0x28   :  { %v1465_v62 = vld [vmem:[%s2296_s0 + $0x1c8] sm:$0xff]  ;;  %v1435_v7 = vld [vmem:[%s2296_s0 + $0xd8] sm:$0xff] }
  0x29   :  { %v1467_v8 = vld [vmem:[%s2296_s0 + $0x1d8] sm:$0xff]  ;;  %v1437_v15 = vld [vmem:[%s2296_s0 + $0xe8] sm:$0xff] }
  0x2a   :  { %1590 = vmatmul.mubr.f32.vlgmr.msra.gmra.mrb[0].mxu0 %v33_v31  ;;  %1638 = vmatmul.mubr.f32.vlgmr.msra.gmra.mrb[0].mxu1 %v353_v32  ;;  %v1426_v31 = vld [vmem:[%s2296_s0 + $0x90] sm:$0xff]  ;;  %v1469_v16 = vld [vmem:[%s2296_s0 + $0x1e8] sm:$0xff]  ;;  %v1439_v23 = vld [vmem:[%s2296_s0 + $0xf8] sm:$0xff] }
  0x2b   :  { %1592 = vmatprep.mubr.f32.mxu0 %v43_v33  ;;  %1640 = vmatprep.mubr.f32.mxu1 %v363_v34  ;;  %v1458_v32 = vld [vmem:[%s2296_s0 + $0x190] sm:$0xff]  ;;  %v193_v33 = vsel %vm23_vm0, %v1425_v29, %v1787_v0  ;;  %v513_v34 = vsel %vm23_vm0, %v1457_v30, %v1787_v0  ;;  %v203_v35 = vsel %vm23_vm0, %v1426_v31, %v1787_v0  ;;  %v1471_v24 = vld [vmem:[%s2296_s0 + $0x1f8] sm:$0xff] }
  0x2c   :  { %v523_v36 = vsel %vm23_vm0, %v1458_v32, %v1787_v0 }
  0x2e   :  { %1593 = vmatmul.mubr.f32.gmra.mrb[2].mxu0 %v53_v39  ;;  %1641 = vmatmul.mubr.f32.gmra.mrb[2].mxu1 %v373_v40  ;;  %v1428_v39 = vld [vmem:[%s2296_s0 + $0xa0] sm:$0xff] }
  0x2f   :  { %1595 = vmatprep.mubr.f32.mxu0 %v63_v41  ;;  %1643 = vmatprep.mubr.f32.mxu1 %v383_v42  ;;  %v1460_v40 = vld [vmem:[%s2296_s0 + $0x1a0] sm:$0xff]  ;;  %v213_v41 = vsel %vm23_vm0, %v1427_v37, %v1787_v0  ;;  %v533_v42 = vsel %vm23_vm0, %v1459_v38, %v1787_v0  ;;  %v223_v43 = vsel %vm23_vm0, %v1428_v39, %v1787_v0 }
  0x30   :  { %v543_v44 = vsel %vm23_vm0, %v1460_v40, %v1787_v0 }
  0x32   :  { %1596 = vmatmul.mubr.f32.gmra.mrb[4].mxu0 %v73_v47  ;;  %1644 = vmatmul.mubr.f32.gmra.mrb[4].mxu1 %v393_v48  ;;  %v1430_v47 = vld [vmem:[%s2296_s0 + $0xb0] sm:$0xff] }
  0x33   :  { %1598 = vmatprep.mubr.f32.mxu0 %v83_v49  ;;  %1646 = vmatprep.mubr.f32.mxu1 %v403_v50  ;;  %v1462_v48 = vld [vmem:[%s2296_s0 + $0x1b0] sm:$0xff]  ;;  %v233_v49 = vsel %vm23_vm0, %v1429_v45, %v1787_v0  ;;  %v553_v50 = vsel %vm23_vm0, %v1461_v46, %v1787_v0  ;;  %v243_v51 = vsel %vm23_vm0, %v1430_v47, %v1787_v0 }
  0x34   :  { %v563_v52 = vsel %vm23_vm0, %v1462_v48, %v1787_v0 }
  0x36   :  { %1599 = vmatmul.mubr.f32.gmra.mrb[6].mxu0 %v93_v55  ;;  %1647 = vmatmul.mubr.f32.gmra.mrb[6].mxu1 %v413_v56  ;;  %v1432_v55 = vld [vmem:[%s2296_s0 + $0xc0] sm:$0xff] }
  0x37   :  { %1601 = vmatprep.mubr.f32.mxu0 %v103_v57  ;;  %1649 = vmatprep.mubr.f32.mxu1 %v423_v58  ;;  %v1464_v56 = vld [vmem:[%s2296_s0 + $0x1c0] sm:$0xff]  ;;  %v253_v57 = vsel %vm23_vm0, %v1431_v53, %v1787_v0  ;;  %v573_v58 = vsel %vm23_vm0, %v1463_v54, %v1787_v0  ;;  %v263_v59 = vsel %vm23_vm0, %v1432_v55, %v1787_v0 }
  0x38   :  { %v583_v60 = vsel %vm23_vm0, %v1464_v56, %v1787_v0 }
  0x3a   :  { %1602 = vmatmul.mubr.f32.gmra.mrb[8].mxu0 %v113_v63  ;;  %1650 = vmatmul.mubr.f32.gmra.mrb[8].mxu1 %v433_v1  ;;  %v1434_v63 = vld [vmem:[%s2296_s0 + $0xd0] sm:$0xff] }
  0x3b   :  { %1604 = vmatprep.mubr.f32.mxu0 %v123_v2  ;;  %1652 = vmatprep.mubr.f32.mxu1 %v443_v4  ;;  %v1466_v1 = vld [vmem:[%s2296_s0 + $0x1d0] sm:$0xff]  ;;  %v273_v2 = vsel %vm23_vm0, %v1433_v61, %v1787_v0  ;;  %v593_v4 = vsel %vm23_vm0, %v1465_v62, %v1787_v0  ;;  %v283_v5 = vsel %vm23_vm0, %v1434_v63, %v1787_v0 }
  0x3c   :  { %v603_v6 = vsel %vm23_vm0, %v1466_v1, %v1787_v0 }
  0x3e   :  { %1605 = vmatmul.mubr.f32.gmra.mrb[10].mxu0 %v133_v9  ;;  %1653 = vmatmul.mubr.f32.gmra.mrb[10].mxu1 %v453_v10  ;;  %v1436_v9 = vld [vmem:[%s2296_s0 + $0xe0] sm:$0xff] }
  0x3f   :  { %1607 = vmatprep.mubr.f32.mxu0 %v143_v11  ;;  %1655 = vmatprep.mubr.f32.mxu1 %v463_v12  ;;  %v1468_v10 = vld [vmem:[%s2296_s0 + $0x1e0] sm:$0xff]  ;;  %v293_v11 = vsel %vm23_vm0, %v1435_v7, %v1787_v0  ;;  %v613_v12 = vsel %vm23_vm0, %v1467_v8, %v1787_v0  ;;  %v303_v13 = vsel %vm23_vm0, %v1436_v9, %v1787_v0 }
  0x40   :  { %v623_v14 = vsel %vm23_vm0, %v1468_v10, %v1787_v0 }
  0x42   :  { %1608 = vmatmul.mubr.f32.gmra.mrb[12].mxu0 %v153_v17  ;;  %1656 = vmatmul.mubr.f32.gmra.mrb[12].mxu1 %v473_v18  ;;  %v1438_v17 = vld [vmem:[%s2296_s0 + $0xf0] sm:$0xff] }
  0x43   :  { %1610 = vmatprep.mubr.f32.mxu0 %v163_v19  ;;  %1658 = vmatprep.mubr.f32.mxu1 %v483_v20  ;;  %v1470_v18 = vld [vmem:[%s2296_s0 + $0x1f0] sm:$0xff]  ;;  %v313_v19 = vsel %vm23_vm0, %v1437_v15, %v1787_v0  ;;  %v633_v20 = vsel %vm23_vm0, %v1469_v16, %v1787_v0  ;;  %v323_v21 = vsel %vm23_vm0, %v1438_v17, %v1787_v0  ;;  %s1758_s0 = smov [#allocation17]  }
  0x44   :  { %v643_v22 = vsel %vm23_vm0, %v1470_v18, %v1787_v0  ;;  %s1401_s12 = sshll.u32 %s1758_s0, 4  ;;  %s1402_s12 = int_to_ptr.vmem [resolvable:$true] %s1401_s12 }
  0x45   :  { %s1734_s13 = scalar_lea.vmem %s1402_s12, 32  ;;  %p1739_p1 = scmp.lt.s32.totalorder %s1402_s12, %s1402_s12 }
  0x46   :  { %1611 = vmatmul.mubr.f32.gmra.mrb[14].mxu0 %v173_v25  ;;  %1659 = vmatmul.mubr.f32.gmra.mrb[14].mxu1 %v493_v26  ;;  %v333_v25 = vsel %vm23_vm0, %v1439_v23, %v1787_v0  ;;  %v653_v26 = vsel %vm23_vm0, %v1471_v24, %v1787_v0  ;;  %p1735_p0 = scmp.ne.s32.totalorder %s1402_s12, %s1734_s13  ;;  %p1740_p2 = scmp.lt.s32.totalorder %s1734_s13, %s1734_s13 }
  0x47   :  { %1613 = vmatprep.mubr.f32.mxu0 %v183_v27  ;;  %1661 = vmatprep.mubr.f32.mxu1 %v503_v28  ;;  %v2218_v27 = vld [vmem:[#allocation21] ss:$0 sm:$0xff] }
  0x48   :  { %p1741_p3 = por %p1740_p2, %p1739_p1 }
  0x4a   :  { %1614 = vmatmul.mubr.f32.gmra.mrb[16].mxu0 %v193_v33  ;;  %1662 = vmatmul.mubr.f32.gmra.mrb[16].mxu1 %v513_v34  ;;  %p1742_p4 = pnand %p1741_p3, %p1735_p0 }
  0x4b   :  { %1616 = vmatprep.mubr.f32.mxu0 %v203_v35  ;;  %1664 = vmatprep.mubr.f32.mxu1 %v523_v36 }
  0x4e   :  { %1617 = vmatmul.mubr.f32.gmra.mrb[18].mxu0 %v213_v41  ;;  %1665 = vmatmul.mubr.f32.gmra.mrb[18].mxu1 %v533_v42 }
  0x4f   :  { %1619 = vmatprep.mubr.f32.mxu0 %v223_v43  ;;  %1667 = vmatprep.mubr.f32.mxu1 %v543_v44 }
  0x52   :  { %1620 = vmatmul.mubr.f32.gmra.mrb[20].mxu0 %v233_v49  ;;  %1668 = vmatmul.mubr.f32.gmra.mrb[20].mxu1 %v553_v50 }
  0x53   :  { %1622 = vmatprep.mubr.f32.mxu0 %v243_v51  ;;  %1670 = vmatprep.mubr.f32.mxu1 %v563_v52 }
  0x56   :  { %1623 = vmatmul.mubr.f32.gmra.mrb[22].mxu0 %v253_v57  ;;  %1671 = vmatmul.mubr.f32.gmra.mrb[22].mxu1 %v573_v58 }
  0x57   :  { %1625 = vmatprep.mubr.f32.mxu0 %v263_v59  ;;  %1673 = vmatprep.mubr.f32.mxu1 %v583_v60 }
  0x5a   :  { %1626 = vmatmul.mubr.f32.gmra.mrb[24].mxu0 %v273_v2  ;;  %1674 = vmatmul.mubr.f32.gmra.mrb[24].mxu1 %v593_v4 }
  0x5b   :  { %1628 = vmatprep.mubr.f32.mxu0 %v283_v5  ;;  %1676 = vmatprep.mubr.f32.mxu1 %v603_v6 }
  0x5e   :  { %1629 = vmatmul.mubr.f32.gmra.mrb[26].mxu0 %v293_v11  ;;  %1677 = vmatmul.mubr.f32.gmra.mrb[26].mxu1 %v613_v12 }
  0x5f   :  { %1631 = vmatprep.mubr.f32.mxu0 %v303_v13  ;;  %1679 = vmatprep.mubr.f32.mxu1 %v623_v14 }
  0x62   :  { %1632 = vmatmul.mubr.f32.gmra.mrb[28].mxu0 %v313_v19  ;;  %1680 = vmatmul.mubr.f32.gmra.mrb[28].mxu1 %v633_v20 }
  0x63   :  { %1634 = vmatprep.mubr.f32.mxu0 %v323_v21  ;;  %1682 = vmatprep.mubr.f32.mxu1 %v643_v22 }
  0x66   :  { %1635 = vmatmul.mubr.f32.gmra.mrb[30].mxu0 %v333_v25  ;;  %1683 = vmatmul.mubr.f32.gmra.mrb[30].mxu1 %v653_v26 }
  0xfd   :  { %v1591_v28 = vpop.f32.mrb[0].mxu0  ;;  %v1639_v29 = vpop.f32.mrb[0].mxu1 }
  0xfe   :  { %v935_v30 = vadd.f32 %v1591_v28, %v2218_v27  ;;  %v1095_v31 = vadd.f32 %v1639_v29, %v2218_v27  ;;  %v929_v32 = vpop.f32.mrb[1].mxu0  ;;  %v1089_v33 = vpop.f32.mrb[1].mxu1 }
  0xff   :  { %v930_v34 = vadd.f32 %v2218_v27, %v929_v32  ;;  %v1090_v35 = vadd.f32 %v2218_v27, %v1089_v33 }
 0x100   :  { %v1249_v36 = vmax.f32 %v935_v30, 0.0  ;;  %v1281_v37 = vmax.f32 %v1095_v31, 0.0 }
 0x101   :  { %v1248_v3 = vmax.f32 %v930_v34, 0.0  ;;  %v1280_v0 = vmax.f32 %v1090_v35, 0.0  ;;  %v1594_v38 = vpop.f32.mrb[2].mxu0  ;;  %v1642_v39 = vpop.f32.mrb[2].mxu1 }
 0x102   :  { %v945_v40 = vadd.f32 %v1594_v38, %v2218_v27  ;;  %v1105_v41 = vadd.f32 %v1642_v39, %v2218_v27  ;;  %v939_v42 = vpop.f32.mrb[3].mxu0  ;;  %v1099_v43 = vpop.f32.mrb[3].mxu1 }
 0x103   :  { %v1312_v44 = vadd.f32 %v1249_v36, %v1248_v3  ;;  %v1349_v45 = vadd.f32 %v1281_v37, %v1280_v0  ;;  %v940_v46 = vadd.f32 %v2218_v27, %v939_v42  ;;  %v1100_v47 = vadd.f32 %v2218_v27, %v1099_v43 }
 0x104   :  { %v1251_v52 = vmax.f32 %v945_v40, 0.0  ;;  %v1283_v53 = vmax.f32 %v1105_v41, 0.0 }
 0x105   :  { %v1250_v48 = vmax.f32 %v940_v46, 0.0  ;;  %v1282_v49 = vmax.f32 %v1100_v47, 0.0  ;;  %v1597_v50 = vpop.f32.mrb[4].mxu0  ;;  %v1645_v51 = vpop.f32.mrb[4].mxu1 }
 0x106   :  { %v955_v54 = vadd.f32 %v1597_v50, %v2218_v27  ;;  %v1115_v55 = vadd.f32 %v1645_v51, %v2218_v27  ;;  %v949_v56 = vpop.f32.mrb[5].mxu0  ;;  %v1109_v57 = vpop.f32.mrb[5].mxu1 }
 0x107   :  { %v1313_v58 = vadd.f32 %v1312_v44, %v1250_v48  ;;  %v1350_v59 = vadd.f32 %v1349_v45, %v1282_v49  ;;  %v950_v60 = vadd.f32 %v2218_v27, %v949_v56  ;;  %v1110_v61 = vadd.f32 %v2218_v27, %v1109_v57 }
 0x108   :  { %v1253_v6 = vmax.f32 %v955_v54, 0.0  ;;  %v1285_v7 = vmax.f32 %v1115_v55, 0.0 }
 0x109   :  { %v1252_v62 = vmax.f32 %v950_v60, 0.0  ;;  %v1314_v63 = vadd.f32 %v1313_v58, %v1251_v52  ;;  %v1284_v1 = vmax.f32 %v1110_v61, 0.0  ;;  %v1351_v2 = vadd.f32 %v1350_v59, %v1283_v53  ;;  %v1600_v4 = vpop.f32.mrb[6].mxu0  ;;  %v1648_v5 = vpop.f32.mrb[6].mxu1 }
 0x10a   :  { %v965_v8 = vadd.f32 %v1600_v4, %v2218_v27  ;;  %v1125_v9 = vadd.f32 %v1648_v5, %v2218_v27  ;;  %v959_v10 = vpop.f32.mrb[7].mxu0  ;;  %v1119_v11 = vpop.f32.mrb[7].mxu1 }
 0x10b   :  { %v1315_v12 = vadd.f32 %v1314_v63, %v1252_v62  ;;  %v1352_v13 = vadd.f32 %v1351_v2, %v1284_v1  ;;  %v960_v14 = vadd.f32 %v2218_v27, %v959_v10  ;;  %v1120_v15 = vadd.f32 %v2218_v27, %v1119_v11 }
 0x10c   :  { %v1255_v22 = vmax.f32 %v965_v8, 0.0  ;;  %v1287_v23 = vmax.f32 %v1125_v9, 0.0 }
 0x10d   :  { %v1254_v16 = vmax.f32 %v960_v14, 0.0  ;;  %v1316_v17 = vadd.f32 %v1315_v12, %v1253_v6  ;;  %v1286_v18 = vmax.f32 %v1120_v15, 0.0  ;;  %v1353_v19 = vadd.f32 %v1352_v13, %v1285_v7  ;;  %v1603_v20 = vpop.f32.mrb[8].mxu0  ;;  %v1651_v21 = vpop.f32.mrb[8].mxu1 }
 0x10e   :  { %v975_v24 = vadd.f32 %v1603_v20, %v2218_v27  ;;  %v1135_v25 = vadd.f32 %v1651_v21, %v2218_v27  ;;  %v969_v26 = vpop.f32.mrb[9].mxu0  ;;  %v1129_v28 = vpop.f32.mrb[9].mxu1 }
 0x10f   :  { %v1317_v29 = vadd.f32 %v1316_v17, %v1254_v16  ;;  %v1354_v30 = vadd.f32 %v1353_v19, %v1286_v18  ;;  %v970_v31 = vadd.f32 %v2218_v27, %v969_v26  ;;  %v1130_v32 = vadd.f32 %v2218_v27, %v1129_v28 }
 0x110   :  { %v1257_v0 = vmax.f32 %v975_v24, 0.0  ;;  %v1289_v38 = vmax.f32 %v1135_v25, 0.0 }
 0x111   :  { %v1256_v33 = vmax.f32 %v970_v31, 0.0  ;;  %v1318_v34 = vadd.f32 %v1317_v29, %v1255_v22  ;;  %v1288_v35 = vmax.f32 %v1130_v32, 0.0  ;;  %v1355_v36 = vadd.f32 %v1354_v30, %v1287_v23  ;;  %v1606_v37 = vpop.f32.mrb[10].mxu0  ;;  %v1654_v3 = vpop.f32.mrb[10].mxu1 }
 0x112   :  { %v985_v39 = vadd.f32 %v1606_v37, %v2218_v27  ;;  %v1145_v40 = vadd.f32 %v1654_v3, %v2218_v27  ;;  %v979_v41 = vpop.f32.mrb[11].mxu0  ;;  %v1139_v42 = vpop.f32.mrb[11].mxu1 }
 0x113   :  { %v1319_v43 = vadd.f32 %v1318_v34, %v1256_v33  ;;  %v1356_v44 = vadd.f32 %v1355_v36, %v1288_v35  ;;  %v980_v45 = vadd.f32 %v2218_v27, %v979_v41  ;;  %v1140_v46 = vadd.f32 %v2218_v27, %v1139_v42 }
 0x114   :  { %v1259_v53 = vmax.f32 %v985_v39, 0.0  ;;  %v1291_v54 = vmax.f32 %v1145_v40, 0.0 }
 0x115   :  { %v1258_v47 = vmax.f32 %v980_v45, 0.0  ;;  %v1320_v48 = vadd.f32 %v1319_v43, %v1257_v0  ;;  %v1290_v49 = vmax.f32 %v1140_v46, 0.0  ;;  %v1357_v50 = vadd.f32 %v1356_v44, %v1289_v38  ;;  %v1609_v51 = vpop.f32.mrb[12].mxu0  ;;  %v1657_v52 = vpop.f32.mrb[12].mxu1 }
 0x116   :  { %v995_v55 = vadd.f32 %v1609_v51, %v2218_v27  ;;  %v1155_v56 = vadd.f32 %v1657_v52, %v2218_v27  ;;  %v989_v57 = vpop.f32.mrb[13].mxu0  ;;  %v1149_v58 = vpop.f32.mrb[13].mxu1 }
 0x117   :  { %v1321_v59 = vadd.f32 %v1320_v48, %v1258_v47  ;;  %v1358_v60 = vadd.f32 %v1357_v50, %v1290_v49  ;;  %v990_v61 = vadd.f32 %v2218_v27, %v989_v57  ;;  %v1150_v62 = vadd.f32 %v2218_v27, %v1149_v58 }
 0x118   :  { %v1261_v7 = vmax.f32 %v995_v55, 0.0  ;;  %v1293_v8 = vmax.f32 %v1155_v56, 0.0 }
 0x119   :  { %v1260_v63 = vmax.f32 %v990_v61, 0.0  ;;  %v1322_v1 = vadd.f32 %v1321_v59, %v1259_v53  ;;  %v1292_v2 = vmax.f32 %v1150_v62, 0.0  ;;  %v1359_v4 = vadd.f32 %v1358_v60, %v1291_v54  ;;  %v1612_v5 = vpop.f32.mrb[14].mxu0  ;;  %v1660_v6 = vpop.f32.mrb[14].mxu1 }
 0x11a   :  { %v1005_v9 = vadd.f32 %v1612_v5, %v2218_v27  ;;  %v1165_v10 = vadd.f32 %v1660_v6, %v2218_v27  ;;  %v999_v11 = vpop.f32.mrb[15].mxu0  ;;  %v1159_v12 = vpop.f32.mrb[15].mxu1 }
 0x11b   :  { %v1323_v13 = vadd.f32 %v1322_v1, %v1260_v63  ;;  %v1360_v14 = vadd.f32 %v1359_v4, %v1292_v2  ;;  %v1000_v15 = vadd.f32 %v2218_v27, %v999_v11  ;;  %v1160_v16 = vadd.f32 %v2218_v27, %v1159_v12 }
 0x11c   :  { %v1263_v23 = vmax.f32 %v1005_v9, 0.0  ;;  %v1295_v24 = vmax.f32 %v1165_v10, 0.0 }
 0x11d   :  { %v1262_v17 = vmax.f32 %v1000_v15, 0.0  ;;  %v1324_v18 = vadd.f32 %v1323_v13, %v1261_v7  ;;  %v1294_v19 = vmax.f32 %v1160_v16, 0.0  ;;  %v1361_v20 = vadd.f32 %v1360_v14, %v1293_v8  ;;  %v1615_v21 = vpop.f32.mrb[16].mxu0  ;;  %v1663_v22 = vpop.f32.mrb[16].mxu1 }
 0x11e   :  { %v1015_v25 = vadd.f32 %v1615_v21, %v2218_v27  ;;  %v1175_v26 = vadd.f32 %v1663_v22, %v2218_v27  ;;  %v1009_v28 = vpop.f32.mrb[17].mxu0  ;;  %v1169_v29 = vpop.f32.mrb[17].mxu1 }
 0x11f   :  { %v1325_v30 = vadd.f32 %v1324_v18, %v1262_v17  ;;  %v1362_v31 = vadd.f32 %v1361_v20, %v1294_v19  ;;  %v1010_v32 = vadd.f32 %v2218_v27, %v1009_v28  ;;  %v1170_v33 = vadd.f32 %v2218_v27, %v1169_v29 }
 0x120   :  { %v1265_v38 = vmax.f32 %v1015_v25, 0.0  ;;  %v1297_v39 = vmax.f32 %v1175_v26, 0.0 }
 0x121   :  { %v1264_v34 = vmax.f32 %v1010_v32, 0.0  ;;  %v1326_v35 = vadd.f32 %v1325_v30, %v1263_v23  ;;  %v1296_v36 = vmax.f32 %v1170_v33, 0.0  ;;  %v1363_v37 = vadd.f32 %v1362_v31, %v1295_v24  ;;  %v1618_v3 = vpop.f32.mrb[18].mxu0  ;;  %v1666_v0 = vpop.f32.mrb[18].mxu1 }
 0x122   :  { %v1025_v40 = vadd.f32 %v1618_v3, %v2218_v27  ;;  %v1185_v41 = vadd.f32 %v1666_v0, %v2218_v27  ;;  %v1019_v42 = vpop.f32.mrb[19].mxu0  ;;  %v1179_v43 = vpop.f32.mrb[19].mxu1 }
 0x123   :  { %v1327_v44 = vadd.f32 %v1326_v35, %v1264_v34  ;;  %v1364_v45 = vadd.f32 %v1363_v37, %v1296_v36  ;;  %v1020_v46 = vadd.f32 %v2218_v27, %v1019_v42  ;;  %v1180_v47 = vadd.f32 %v2218_v27, %v1179_v43 }
 0x124   :  { %v1267_v54 = vmax.f32 %v1025_v40, 0.0  ;;  %v1299_v55 = vmax.f32 %v1185_v41, 0.0 }
 0x125   :  { %v1266_v48 = vmax.f32 %v1020_v46, 0.0  ;;  %v1328_v49 = vadd.f32 %v1327_v44, %v1265_v38  ;;  %v1298_v50 = vmax.f32 %v1180_v47, 0.0  ;;  %v1365_v51 = vadd.f32 %v1364_v45, %v1297_v39  ;;  %v1621_v52 = vpop.f32.mrb[20].mxu0  ;;  %v1669_v53 = vpop.f32.mrb[20].mxu1 }
 0x126   :  { %v1035_v56 = vadd.f32 %v1621_v52, %v2218_v27  ;;  %v1195_v57 = vadd.f32 %v1669_v53, %v2218_v27  ;;  %v1029_v58 = vpop.f32.mrb[21].mxu0  ;;  %v1189_v59 = vpop.f32.mrb[21].mxu1 }
 0x127   :  { %v1329_v60 = vadd.f32 %v1328_v49, %v1266_v48  ;;  %v1366_v61 = vadd.f32 %v1365_v51, %v1298_v50  ;;  %v1030_v62 = vadd.f32 %v2218_v27, %v1029_v58  ;;  %v1190_v63 = vadd.f32 %v2218_v27, %v1189_v59 }
 0x128   :  { %v1269_v8 = vmax.f32 %v1035_v56, 0.0  ;;  %v1301_v9 = vmax.f32 %v1195_v57, 0.0 }
 0x129   :  { %v1268_v1 = vmax.f32 %v1030_v62, 0.0  ;;  %v1330_v2 = vadd.f32 %v1329_v60, %v1267_v54  ;;  %v1300_v4 = vmax.f32 %v1190_v63, 0.0  ;;  %v1367_v5 = vadd.f32 %v1366_v61, %v1299_v55  ;;  %v1624_v6 = vpop.f32.mrb[22].mxu0  ;;  %v1672_v7 = vpop.f32.mrb[22].mxu1 }
 0x12a   :  { %v1045_v10 = vadd.f32 %v1624_v6, %v2218_v27  ;;  %v1205_v11 = vadd.f32 %v1672_v7, %v2218_v27  ;;  %v1039_v12 = vpop.f32.mrb[23].mxu0  ;;  %v1199_v13 = vpop.f32.mrb[23].mxu1 }
 0x12b   :  { %v1331_v14 = vadd.f32 %v1330_v2, %v1268_v1  ;;  %v1368_v15 = vadd.f32 %v1367_v5, %v1300_v4  ;;  %v1040_v16 = vadd.f32 %v2218_v27, %v1039_v12  ;;  %v1200_v17 = vadd.f32 %v2218_v27, %v1199_v13 }
 0x12c   :  { %v1271_v24 = vmax.f32 %v1045_v10, 0.0  ;;  %v1303_v25 = vmax.f32 %v1205_v11, 0.0 }
 0x12d   :  { %v1270_v18 = vmax.f32 %v1040_v16, 0.0  ;;  %v1332_v19 = vadd.f32 %v1331_v14, %v1269_v8  ;;  %v1302_v20 = vmax.f32 %v1200_v17, 0.0  ;;  %v1369_v21 = vadd.f32 %v1368_v15, %v1301_v9  ;;  %v1627_v22 = vpop.f32.mrb[24].mxu0  ;;  %v1675_v23 = vpop.f32.mrb[24].mxu1 }
 0x12e   :  { %v1055_v26 = vadd.f32 %v1627_v22, %v2218_v27  ;;  %v1215_v28 = vadd.f32 %v1675_v23, %v2218_v27  ;;  %v1049_v29 = vpop.f32.mrb[25].mxu0  ;;  %v1209_v30 = vpop.f32.mrb[25].mxu1 }
 0x12f   :  { %v1333_v31 = vadd.f32 %v1332_v19, %v1270_v18  ;;  %v1370_v32 = vadd.f32 %v1369_v21, %v1302_v20  ;;  %v1050_v33 = vadd.f32 %v2218_v27, %v1049_v29  ;;  %v1210_v34 = vadd.f32 %v2218_v27, %v1209_v30 }
 0x130   :  { %v1273_v39 = vmax.f32 %v1055_v26, 0.0  ;;  %v1305_v40 = vmax.f32 %v1215_v28, 0.0 }
 0x131   :  { %v1272_v35 = vmax.f32 %v1050_v33, 0.0  ;;  %v1334_v36 = vadd.f32 %v1333_v31, %v1271_v24  ;;  %v1304_v37 = vmax.f32 %v1210_v34, 0.0  ;;  %v1371_v3 = vadd.f32 %v1370_v32, %v1303_v25  ;;  %v1630_v0 = vpop.f32.mrb[26].mxu0  ;;  %v1678_v38 = vpop.f32.mrb[26].mxu1 }
 0x132   :  { %v1065_v41 = vadd.f32 %v1630_v0, %v2218_v27  ;;  %v1225_v42 = vadd.f32 %v1678_v38, %v2218_v27  ;;  %v1059_v43 = vpop.f32.mrb[27].mxu0  ;;  %v1219_v44 = vpop.f32.mrb[27].mxu1 }
 0x133   :  { %v1335_v45 = vadd.f32 %v1334_v36, %v1272_v35  ;;  %v1372_v46 = vadd.f32 %v1371_v3, %v1304_v37  ;;  %v1060_v47 = vadd.f32 %v2218_v27, %v1059_v43  ;;  %v1220_v48 = vadd.f32 %v2218_v27, %v1219_v44 }
 0x134   :  { %v1275_v55 = vmax.f32 %v1065_v41, 0.0  ;;  %v1307_v56 = vmax.f32 %v1225_v42, 0.0 }
 0x135   :  { %v1274_v49 = vmax.f32 %v1060_v47, 0.0  ;;  %v1336_v50 = vadd.f32 %v1335_v45, %v1273_v39  ;;  %v1306_v51 = vmax.f32 %v1220_v48, 0.0  ;;  %v1373_v52 = vadd.f32 %v1372_v46, %v1305_v40  ;;  %v1633_v53 = vpop.f32.mrb[28].mxu0  ;;  %v1681_v54 = vpop.f32.mrb[28].mxu1 }
 0x136   :  { %v1075_v57 = vadd.f32 %v1633_v53, %v2218_v27  ;;  %v1235_v58 = vadd.f32 %v1681_v54, %v2218_v27  ;;  %v1069_v59 = vpop.f32.mrb[29].mxu0  ;;  %v1229_v60 = vpop.f32.mrb[29].mxu1 }
 0x137   :  { %v1337_v61 = vadd.f32 %v1336_v50, %v1274_v49  ;;  %v1374_v62 = vadd.f32 %v1373_v52, %v1306_v51  ;;  %v1070_v63 = vadd.f32 %v2218_v27, %v1069_v59  ;;  %v1230_v1 = vadd.f32 %v2218_v27, %v1229_v60 }
 0x138   :  { %v1277_v9 = vmax.f32 %v1075_v57, 0.0  ;;  %v1309_v10 = vmax.f32 %v1235_v58, 0.0 }
 0x139   :  { %v1276_v2 = vmax.f32 %v1070_v63, 0.0  ;;  %v1338_v4 = vadd.f32 %v1337_v61, %v1275_v55  ;;  %v1308_v5 = vmax.f32 %v1230_v1, 0.0  ;;  %v1375_v6 = vadd.f32 %v1374_v62, %v1307_v56  ;;  %v1636_v7 = vpop.f32.mrb[30].mxu0  ;;  %v1684_v8 = vpop.f32.mrb[30].mxu1 }
 0x13a   :  { %v1085_v11 = vadd.f32 %v1636_v7, %v2218_v27  ;;  %v1245_v12 = vadd.f32 %v1684_v8, %v2218_v27  ;;  %v1079_v13 = vpop.f32.mrb[31].mxu0  ;;  %v1239_v14 = vpop.f32.mrb[31].mxu1 }
 0x13b   :  { %v1339_v15 = vadd.f32 %v1338_v4, %v1276_v2  ;;  %v1376_v16 = vadd.f32 %v1375_v6, %v1308_v5  ;;  %v1080_v17 = vadd.f32 %v2218_v27, %v1079_v13  ;;  %v1240_v18 = vadd.f32 %v2218_v27, %v1239_v14 }
 0x13c   :  { %v1279_v23 = vmax.f32 %v1085_v11, 0.0  ;;  %v1311_v24 = vmax.f32 %v1245_v12, 0.0 }
 0x13d   :  { %v1278_v19 = vmax.f32 %v1080_v17, 0.0  ;;  %v1340_v20 = vadd.f32 %v1339_v15, %v1277_v9  ;;  %v1310_v21 = vmax.f32 %v1240_v18, 0.0  ;;  %v1377_v22 = vadd.f32 %v1376_v16, %v1309_v10 }
 0x13f   :  { %v1341_v25 = vadd.f32 %v1340_v20, %v1278_v19  ;;  %v1378_v26 = vadd.f32 %v1377_v22, %v1310_v21 }
 0x141   :  { %v1342_v28 = vadd.f32 %v1341_v25, %v1279_v23  ;;  %v1379_v29 = vadd.f32 %v1378_v26, %v1311_v24 }
 0x143   :  { %v1343_v30 = vrot.slane %v1342_v28, 4  ;;  %v1380_v31 = vrot.slane %v1379_v29, 4 }
 0x145   :  { %v1344_v32 = vadd.f32 %v1343_v30, %v1342_v28  ;;  %v1381_v33 = vadd.f32 %v1380_v31, %v1379_v29 }
 0x147   :  { %v1345_v34 = vrot.slane %v1344_v32, 2  ;;  %v1382_v35 = vrot.slane %v1381_v33, 2 }
 0x149   :  { %v1346_v36 = vadd.f32 %v1345_v34, %v1344_v32  ;;  %v1383_v37 = vadd.f32 %v1382_v35, %v1381_v33 }
 0x14b   :  { %v1347_v3 = vrot.slane %v1346_v36, 1  ;;  %v1384_v27 = vrot.slane %v1383_v37, 1 }
 0x14d   :  { %v1348_v0 = vadd.f32 %v1347_v3, %v1346_v36  ;;  %v1385_v38 = vadd.f32 %v1384_v27, %v1383_v37 }
 0x14f   :  { %v1387_v39 = vmul.f32 0.00390625, %v1348_v0  ;;  %v1388_v40 = vmul.f32 0.00390625, %v1385_v38 }
 0x151   :  { %v1392_v41 = vsel %vm1391_vm4, %v1388_v40, %v1387_v39 }
 0x152   :  { %1394 = vst [vmem:[#allocation17] sm:$0x3] %v1392_v41 }
 0x153   :  { %1745 = shalt.err (!%p1742_p4)
}
 0x154   :  { %s1746_s16 = scalar_lea.hbm %s2300_s4, 32 }
 0x155   :  { %p1747_p5 = scmp.ne.s32.totalorder %s2300_s4, %s1746_s16  ;;  %p1750_p6 = scmp.lt.u32.totalorder %s1746_s16, %s2300_s4 }
 0x157   :  { %p1752_p7 = pnand %p1750_p6, %p1747_p5 }
 0x159   :  { %1755 = shalt.err (!%p1752_p7)
}
 0x15a   :  { %1404 = dma.vmem_to_hbm [thread:$0]  %s1402_s12, 32, %s2300_s4, [#allocation18]  }
 0x15b   :  { %1756 = dma.done.wait [#allocation18], 32  }
 0x15c   :  { %1757 = vsyncadd [#allocation18], 4294967264 }
 0x15d   :  { %1408 = vsyncpa [#allocation18], 1 }

</bundles_post_ra>
